<compile_context>
chip_gen: v5e
topology: v5e:2x2
jax: 0.10.0
libtpu: 0.0.40
codegen_flags: <defaults>
</compile_context>

<pallas_src>
import functools

import jax
import jax.numpy as jnp
from jax.experimental import pallas as pl
from jax.experimental.pallas import tpu as pltpu


# ----------------------------- kernel -------------------------------------- #

def point_mil_kernel(pos_ref, neg_ref, pg_ref,
                     w1_ref, b1_ref, w2_ref, b2_ref,
                     ws1_ref, bs1_ref, ws2_ref, bs2_ref,
                     score1_ref, bag_ref, neg_out_ref, pg_out_ref,
                     slab_ref, *, num_gt, num_points, num_classes):
    """Fused forward for all rows (pos | neg | pos_gt | pad) in one pass.

    pos_ref : (G*P, C)   positive point features (flattened)
    neg_ref : (N, C)     negative features
    pg_ref  : (G, C)     positive-GT features
    slab_ref: (R_pad, C) VMEM scratch — rows assembled in-kernel
    outputs : score1 (G,P,K), bag (G,P,K), neg (N,K), pos_gt (G,K)
    """
    G, P, K = num_gt, num_points, num_classes
    gp = G * P
    n_neg = neg_ref.shape[0]
    r = gp + n_neg + G
    r_pad, C = slab_ref.shape

    # --- assemble the row slab directly in VMEM (no wrapper concat) --------
    # Segment offsets here (0, 64, 88) are sublane-aligned; non-aligned cases
    # simply lower to masked stores and stay correct.
    slab_ref[pl.ds(0, gp), :] = pos_ref[...]
    slab_ref[pl.ds(gp, n_neg), :] = neg_ref[...]
    slab_ref[pl.ds(gp + n_neg, G), :] = pg_ref[...]
    if r_pad > r:                                  # static: zero pad rows once
        slab_ref[pl.ds(r, r_pad - r), :] = jnp.zeros((r_pad - r, C),
                                                     slab_ref.dtype)
    x = slab_ref[...]

    # --- shared MLP on the whole slab (one matmul chain feeds the MXU) -----
    h = jnp.maximum(
        jnp.dot(x, w1_ref[...], preferred_element_type=jnp.float32)
        + b1_ref[...], 0.0)
    h = jnp.maximum(
        jnp.dot(h, w2_ref[...], preferred_element_type=jnp.float32)
        + b2_ref[...], 0.0)

    # --- score1 head on all rows (own matmul -> no lane-offset slicing) ----
    s1 = jax.nn.sigmoid(
        jnp.dot(h, ws1_ref[...], preferred_element_type=jnp.float32)
        + bs1_ref[...])                                       # (r_pad, K)

    s1_pos = s1[:gp].reshape(G, P, K)
    neg_out_ref[...] = s1[gp:gp + n_neg]
    pg_out_ref[...] = s1[gp + n_neg:r]

    # --- score2 head + softmax over the points axis (positive rows only) ---
    logits2 = (jnp.dot(h[:gp], ws2_ref[...],
                       preferred_element_type=jnp.float32)
               + bs2_ref[...]).reshape(G, P, K)
    m = jnp.max(logits2, axis=1, keepdims=True)
    e = jnp.exp(logits2 - m)
    denom = jnp.sum(e, axis=1, keepdims=True)
    s2 = e * pl.reciprocal(denom, approx=False)   # exact: keeps 1e-5 tolerance

    score1_ref[...] = s1_pos
    bag_ref[...] = s1_pos * s2


# ----------------------------- wrapper -------------------------------------- #

def point_mil_head_forward(pos_x, neg_x, pos_gt_x, params):
    G, P, C = pos_x.shape
    N = neg_x.shape[0]
    H = params["w1"].shape[1]
    K = params["ws1"].shape[1]
    GP = G * P
    R = GP + N + G
    R_pad = ((R + 7) // 8) * 8          # round slab rows up to sublane multiple

    kernel = functools.partial(point_mil_kernel,
                               num_gt=G, num_points=P, num_classes=K)

    vmem = pl.BlockSpec(memory_space=pltpu.MemorySpace.VMEM)

    flops = 2 * R_pad * (C * H + H * H + H * K) + 2 * GP * H * K
    transcendentals = R_pad * K + 2 * GP * K + G * K
    bytes_accessed = 4 * (R * C + C * H + H * H + 2 * H + 2 * (H * K + K)
                          + 2 * GP * K + N * K + G * K)

    # No grid: whole (tiny) operands live in VMEM as single blocks; one launch,
    # weights DMA'd once, four direct output DMAs, no wrapper-side slicing.
    score1, bag_score, neg_score, pos_gt_score = pl.pallas_call(
        kernel,
        out_shape=(
            jax.ShapeDtypeStruct((G, P, K), jnp.float32),   # score1
            jax.ShapeDtypeStruct((G, P, K), jnp.float32),   # bag_score
            jax.ShapeDtypeStruct((N, K), jnp.float32),      # neg_score
            jax.ShapeDtypeStruct((G, K), jnp.float32),      # pos_gt_score
        ),
        in_specs=[vmem] * 11,
        out_specs=(vmem, vmem, vmem, vmem),
        scratch_shapes=[pltpu.VMEM((R_pad, C), jnp.float32)],
        cost_estimate=pl.CostEstimate(flops=flops,
                                      transcendentals=transcendentals,
                                      bytes_accessed=bytes_accessed),
    )(pos_x.reshape(GP, C), neg_x, pos_gt_x,
      params["w1"], params["b1"], params["w2"], params["b2"],
      params["ws1"], params["bs1"], params["ws2"], params["bs2"])

    return score1, bag_score, neg_score, pos_gt_score


# ----------------------------- reference (pure JAX) ------------------------- #

def _ref_forward(pos_x, neg_x, pos_gt_x, p):
    def mlp(x):
        h = jax.nn.relu(x @ p["w1"] + p["b1"][0])
        return jax.nn.relu(h @ p["w2"] + p["b2"][0])

    h_pos = mlp(pos_x)
    h_neg = mlp(neg_x)
    h_pg = mlp(pos_gt_x)
    score1 = jax.nn.sigmoid(h_pos @ p["ws1"] + p["bs1"][0])
    score2 = jax.nn.softmax(h_pos @ p["ws2"] + p["bs2"][0], axis=-2)
    bag = score1 * score2
    neg = jax.nn.sigmoid(h_neg @ p["ws1"] + p["bs1"][0])
    pg = jax.nn.sigmoid(h_pg @ p["ws1"] + p["bs1"][0])
    return score1, bag, neg, pg


# ----------------------------- main ----------------------------------------- #

def _init_params(key, in_channels, hidden_channels, num_classes):
    ks = jax.random.split(key, 4)

    def trunc(k, shape):
        # trunc_normal_(std=0.02); biases are zero (constant_(bias, 0))
        return (jax.random.truncated_normal(k, -2.0, 2.0, shape, jnp.float32)
                * 0.02)

    return {
        "w1": trunc(ks[0], (in_channels, hidden_channels)),
        "b1": jnp.zeros((1, hidden_channels), jnp.float32),
        "w2": trunc(ks[1], (hidden_channels, hidden_channels)),
        "b2": jnp.zeros((1, hidden_channels), jnp.float32),
        "ws1": trunc(ks[2], (hidden_channels, num_classes)),
        "bs1": jnp.zeros((1, num_classes), jnp.float32),
        "ws2": trunc(ks[3], (hidden_channels, num_classes)),
        "bs2": jnp.zeros((1, num_classes), jnp.float32),
    }


if __name__ == "__main__":
    # small shapes consistent with the module's forward
    in_channels, hidden_channels, num_classes = 32, 64, 8
    num_gt, num_points, num_neg = 4, 16, 24

    key = jax.random.PRNGKey(0)
    k_param, k_pos, k_neg, k_pg = jax.random.split(key, 4)
    params = _init_params(k_param, in_channels, hidden_channels, num_classes)

    pos_x = jax.random.normal(k_pos, (num_gt, num_points, in_channels),
                              jnp.float32)
    neg_x = jax.random.normal(k_neg, (num_neg, in_channels), jnp.float32)
    pos_gt_x = jax.random.normal(k_pg, (num_gt, in_channels), jnp.float32)

    outs = point_mil_head_forward(pos_x, neg_x, pos_gt_x, params)
    outs = jax.block_until_ready(outs)

    refs = _ref_forward(pos_x, neg_x, pos_gt_x, params)
    for o, r in zip(outs, refs):
        assert o.shape == r.shape and o.dtype == r.dtype
        assert jnp.allclose(o, r, atol=1e-5, rtol=1e-5), "mismatch vs reference"

    # TODO(synk): loss() and forward_select_pseudo_point_gts() are training /
    # target-assignment utilities (dynamic boolean indexing, unique, cdist),
    # not part of the forward pass; not implemented as kernels.
    print("KERNEL_OK")
</pallas_src>

<mosaic_0001>
module attributes {stable_mosaic.version = 11 : i64} {
  func.func @point_mil_kernel(%arg0: memref<64x32xf32, #tpu.memory_space<vmem>>, %arg1: memref<24x32xf32, #tpu.memory_space<vmem>>, %arg2: memref<4x32xf32, #tpu.memory_space<vmem>>, %arg3: memref<32x64xf32, #tpu.memory_space<vmem>>, %arg4: memref<1x64xf32, #tpu.memory_space<vmem>>, %arg5: memref<64x64xf32, #tpu.memory_space<vmem>>, %arg6: memref<1x64xf32, #tpu.memory_space<vmem>>, %arg7: memref<64x8xf32, #tpu.memory_space<vmem>>, %arg8: memref<1x8xf32, #tpu.memory_space<vmem>>, %arg9: memref<64x8xf32, #tpu.memory_space<vmem>>, %arg10: memref<1x8xf32, #tpu.memory_space<vmem>>, %arg11: memref<4x16x8xf32, #tpu.memory_space<vmem>>, %arg12: memref<4x16x8xf32, #tpu.memory_space<vmem>>, %arg13: memref<24x8xf32, #tpu.memory_space<vmem>>, %arg14: memref<4x8xf32, #tpu.memory_space<vmem>>, %arg15: memref<96x32xf32, #tpu.memory_space<vmem>>) attributes {dimension_semantics = [], scalar_prefetch = 0 : i64, scratch_operands = 1 : i64, tpu.core_type = #tpu.core_type<tc>} {
    %c0 = arith.constant 0 : index
    %c0_0 = arith.constant 0 : index
    %0 = vector.load %arg0[%c0, %c0_0] : memref<64x32xf32, #tpu.memory_space<vmem>>, vector<64x32xf32>
    %c0_1 = arith.constant 0 : index
    %c0_2 = arith.constant 0 : index
    %1 = vector.load %arg15[%c0_1, %c0_2] : memref<96x32xf32, #tpu.memory_space<vmem>>, vector<64x32xf32>
    tpu.vector_store %arg15[%c0_1, %c0_2], %0 {strides = array<i32>} : memref<96x32xf32, #tpu.memory_space<vmem>>, vector<64x32xf32>,
    %c0_3 = arith.constant 0 : index
    %c0_4 = arith.constant 0 : index
    %2 = vector.load %arg1[%c0_3, %c0_4] : memref<24x32xf32, #tpu.memory_space<vmem>>, vector<24x32xf32>
    %c64 = arith.constant 64 : index
    %c0_5 = arith.constant 0 : index
    %3 = vector.load %arg15[%c64, %c0_5] : memref<96x32xf32, #tpu.memory_space<vmem>>, vector<24x32xf32>
    tpu.vector_store %arg15[%c64, %c0_5], %2 {strides = array<i32>} : memref<96x32xf32, #tpu.memory_space<vmem>>, vector<24x32xf32>,
    %c0_6 = arith.constant 0 : index
    %c0_7 = arith.constant 0 : index
    %4 = vector.load %arg2[%c0_6, %c0_7] : memref<4x32xf32, #tpu.memory_space<vmem>>, vector<4x32xf32>
    %c88 = arith.constant 88 : index
    %c0_8 = arith.constant 0 : index
    %5 = vector.load %arg15[%c88, %c0_8] : memref<96x32xf32, #tpu.memory_space<vmem>>, vector<4x32xf32>
    tpu.vector_store %arg15[%c88, %c0_8], %4 {strides = array<i32>} : memref<96x32xf32, #tpu.memory_space<vmem>>, vector<4x32xf32>,
    %cst = arith.constant 0.000000e+00 : f32
    %6 = vector.broadcast %cst : f32 to vector<4x32xf32>
    %c92 = arith.constant 92 : index
    %c0_9 = arith.constant 0 : index
    %7 = vector.load %arg15[%c92, %c0_9] : memref<96x32xf32, #tpu.memory_space<vmem>>, vector<4x32xf32>
    tpu.vector_store %arg15[%c92, %c0_9], %6 {strides = array<i32>} : memref<96x32xf32, #tpu.memory_space<vmem>>, vector<4x32xf32>,
    %c0_10 = arith.constant 0 : index
    %c0_11 = arith.constant 0 : index
    %8 = vector.load %arg15[%c0_10, %c0_11] : memref<96x32xf32, #tpu.memory_space<vmem>>, vector<96x32xf32>
    %c0_12 = arith.constant 0 : index
    %c0_13 = arith.constant 0 : index
    %9 = vector.load %arg3[%c0_12, %c0_13] : memref<32x64xf32, #tpu.memory_space<vmem>>, vector<32x64xf32>
    %cst_14 = arith.constant dense<0.000000e+00> : vector<96x64xf32>
    %10 = tpu.matmul %8, %9, %cst_14 {dimension_numbers = #tpu.dot_dimension_numbers<[1], [0], [0], [1], [0, 0, 1, 1], [], []>} : vector<96x32xf32>, vector<32x64xf32>, vector<96x64xf32> -> vector<96x64xf32>
    %c0_15 = arith.constant 0 : index
    %c0_16 = arith.constant 0 : index
    %11 = vector.load %arg4[%c0_15, %c0_16] : memref<1x64xf32, #tpu.memory_space<vmem>>, vector<1x64xf32>
    %12 = vector.broadcast %11 : vector<1x64xf32> to vector<96x64xf32>
    %13 = arith.addf %10, %12 : vector<96x64xf32>
    %cst_17 = arith.constant 0.000000e+00 : f32
    %14 = vector.broadcast %cst_17 : f32 to vector<96x64xf32>
    %15 = arith.maximumf %13, %14 : vector<96x64xf32>
    %c0_18 = arith.constant 0 : index
    %c0_19 = arith.constant 0 : index
    %16 = vector.load %arg5[%c0_18, %c0_19] : memref<64x64xf32, #tpu.memory_space<vmem>>, vector<64x64xf32>
    %cst_20 = arith.constant dense<0.000000e+00> : vector<96x64xf32>
    %17 = tpu.matmul %15, %16, %cst_20 {dimension_numbers = #tpu.dot_dimension_numbers<[1], [0], [0], [1], [0, 0, 1, 1], [], []>} : vector<96x64xf32>, vector<64x64xf32>, vector<96x64xf32> -> vector<96x64xf32>
    %c0_21 = arith.constant 0 : index
    %c0_22 = arith.constant 0 : index
    %18 = vector.load %arg6[%c0_21, %c0_22] : memref<1x64xf32, #tpu.memory_space<vmem>>, vector<1x64xf32>
    %19 = vector.broadcast %18 : vector<1x64xf32> to vector<96x64xf32>
    %20 = arith.addf %17, %19 : vector<96x64xf32>
    %cst_23 = arith.constant 0.000000e+00 : f32
    %21 = vector.broadcast %cst_23 : f32 to vector<96x64xf32>
    %22 = arith.maximumf %20, %21 : vector<96x64xf32>
    %c0_24 = arith.constant 0 : index
    %c0_25 = arith.constant 0 : index
    %23 = vector.load %arg7[%c0_24, %c0_25] : memref<64x8xf32, #tpu.memory_space<vmem>>, vector<64x8xf32>
    %cst_26 = arith.constant dense<0.000000e+00> : vector<96x8xf32>
    %24 = tpu.matmul %22, %23, %cst_26 {dimension_numbers = #tpu.dot_dimension_numbers<[1], [0], [0], [1], [0, 0, 1, 1], [], []>} : vector<96x64xf32>, vector<64x8xf32>, vector<96x8xf32> -> vector<96x8xf32>
    %c0_27 = arith.constant 0 : index
    %c0_28 = arith.constant 0 : index
    %25 = vector.load %arg8[%c0_27, %c0_28] : memref<1x8xf32, #tpu.memory_space<vmem>>, vector<1x8xf32>
    %26 = vector.broadcast %25 : vector<1x8xf32> to vector<96x8xf32>
    %27 = arith.addf %24, %26 : vector<96x8xf32>
    %28 = arith.negf %27 : vector<96x8xf32>
    %29 = math.exp %28 : vector<96x8xf32>
    %cst_29 = arith.constant 1.000000e+00 : f32
    %30 = vector.broadcast %cst_29 : f32 to vector<96x8xf32>
    %31 = arith.addf %30, %29 : vector<96x8xf32>
    %32 = arith.divf %30, %31 : vector<96x8xf32>
    %33 = vector.extract_strided_slice %32 {offsets = [0, 0], sizes = [64, 8], strides = [1, 1]} : vector<96x8xf32> to vector<64x8xf32>
    %34 = vector.shape_cast %33 : vector<64x8xf32> to vector<4x16x8xf32>
    %35 = vector.extract_strided_slice %32 {offsets = [64, 0], sizes = [24, 8], strides = [1, 1]} : vector<96x8xf32> to vector<24x8xf32>
    %c0_30 = arith.constant 0 : index
    %c0_31 = arith.constant 0 : index
    %36 = vector.load %arg13[%c0_30, %c0_31] : memref<24x8xf32, #tpu.memory_space<vmem>>, vector<24x8xf32>
    tpu.vector_store %arg13[%c0_30, %c0_31], %35 {strides = array<i32>} : memref<24x8xf32, #tpu.memory_space<vmem>>, vector<24x8xf32>,
    %37 = vector.extract_strided_slice %32 {offsets = [88, 0], sizes = [4, 8], strides = [1, 1]} : vector<96x8xf32> to vector<4x8xf32>
    %c0_32 = arith.constant 0 : index
    %c0_33 = arith.constant 0 : index
    %38 = vector.load %arg14[%c0_32, %c0_33] : memref<4x8xf32, #tpu.memory_space<vmem>>, vector<4x8xf32>
    tpu.vector_store %arg14[%c0_32, %c0_33], %37 {strides = array<i32>} : memref<4x8xf32, #tpu.memory_space<vmem>>, vector<4x8xf32>,
    %39 = vector.extract_strided_slice %22 {offsets = [0, 0], sizes = [64, 64], strides = [1, 1]} : vector<96x64xf32> to vector<64x64xf32>
    %c0_34 = arith.constant 0 : index
    %c0_35 = arith.constant 0 : index
    %40 = vector.load %arg9[%c0_34, %c0_35] : memref<64x8xf32, #tpu.memory_space<vmem>>, vector<64x8xf32>
    %cst_36 = arith.constant dense<0.000000e+00> : vector<64x8xf32>
    %41 = tpu.matmul %39, %40, %cst_36 {dimension_numbers = #tpu.dot_dimension_numbers<[1], [0], [0], [1], [0, 0, 1, 1], [], []>} : vector<64x64xf32>, vector<64x8xf32>, vector<64x8xf32> -> vector<64x8xf32>
    %c0_37 = arith.constant 0 : index
    %c0_38 = arith.constant 0 : index
    %42 = vector.load %arg10[%c0_37, %c0_38] : memref<1x8xf32, #tpu.memory_space<vmem>>, vector<1x8xf32>
    %43 = vector.broadcast %42 : vector<1x8xf32> to vector<64x8xf32>
    %44 = arith.addf %41, %43 : vector<64x8xf32>
    %45 = vector.shape_cast %44 : vector<64x8xf32> to vector<4x16x8xf32>
    %cst_39 = arith.constant dense<0xFF800000> : vector<4x8xf32>
    %46 = vector.multi_reduction <maximumf>, %45, %cst_39 [1] : vector<4x16x8xf32> to vector<4x8xf32>
    %47 = vector.shape_cast %46 : vector<4x8xf32> to vector<4x1x8xf32>
    %48 = vector.broadcast %47 : vector<4x1x8xf32> to vector<4x16x8xf32>
    %49 = arith.subf %45, %48 : vector<4x16x8xf32>
    %50 = math.exp %49 : vector<4x16x8xf32>
    %cst_40 = arith.constant dense<0.000000e+00> : vector<4x8xf32>
    %51 = vector.multi_reduction <add>, %50, %cst_40 [1] : vector<4x16x8xf32> to vector<4x8xf32>
    %52 = vector.shape_cast %51 : vector<4x8xf32> to vector<4x1x8xf32>
    %53 = tpu.reciprocal %52 : vector<4x1x8xf32> -> vector<4x1x8xf32>
    %54 = vector.broadcast %53 : vector<4x1x8xf32> to vector<4x16x8xf32>
    %55 = arith.mulf %50, %54 : vector<4x16x8xf32>
    %c0_41 = arith.constant 0 : index
    %c0_42 = arith.constant 0 : index
    %c0_43 = arith.constant 0 : index
    %56 = vector.load %arg11[%c0_41, %c0_42, %c0_43] : memref<4x16x8xf32, #tpu.memory_space<vmem>>, vector<4x16x8xf32>
    tpu.vector_store %arg11[%c0_41, %c0_42, %c0_43], %34 {strides = array<i32>} : memref<4x16x8xf32, #tpu.memory_space<vmem>>, vector<4x16x8xf32>,
    %57 = arith.mulf %34, %55 : vector<4x16x8xf32>
    %c0_44 = arith.constant 0 : index
    %c0_45 = arith.constant 0 : index
    %c0_46 = arith.constant 0 : index
    %58 = vector.load %arg12[%c0_44, %c0_45, %c0_46] : memref<4x16x8xf32, #tpu.memory_space<vmem>>, vector<4x16x8xf32>
    tpu.vector_store %arg12[%c0_44, %c0_45, %c0_46], %57 {strides = array<i32>} : memref<4x16x8xf32, #tpu.memory_space<vmem>>, vector<4x16x8xf32>,
    return
  }
}

</mosaic_0001>

<bundles_post_ra>
// kernel: tpu_custom_call.1
= control target key start
LH: loop header
LB: loop body
LE: loop exit
PB: predicated region body
PF: predicated region fallthrough
CT: control target
= control target key end

     0   :  { %vm51_vm0 = vcmask 261120   ;;  %s1692_s0 = inlined_call_operand.vmem [shape: f32[64,32], index: 0, kind: input, shape index: {}]   ;;  %s1693_s1 = inlined_call_operand.vmem [shape: f32[24,32], index: 1, kind: input, shape index: {}]   ;;  %s1694_s2 = inlined_call_operand.vmem [shape: f32[4,32], index: 2, kind: input, shape index: {}]   ;;  %s1695_s3 = inlined_call_operand.vmem [shape: f32[32,64], index: 3, kind: input, shape index: {}]   ;;  %s1696_s4 = inlined_call_operand.vmem [shape: f32[1,64], index: 4, kind: input, shape index: {}]   ;;  %s1697_s5 = inlined_call_operand.vmem [shape: f32[64,64], index: 5, kind: input, shape index: {}]   ;;  %s1698_s6 = inlined_call_operand.vmem [shape: f32[1,64], index: 6, kind: input, shape index: {}]   ;;  %s1699_s7 = inlined_call_operand.vmem [shape: f32[64,8], index: 7, kind: input, shape index: {}]   ;;  %s1700_s8 = inlined_call_operand.vmem [shape: f32[1,8], index: 8, kind: input, shape index: {}]   ;;  %s1701_s9 = inlined_call_operand.vmem [shape: f32[64,8], index: 9, kind: input, shape index: {}]   ;;  %s1702_s10 = inlined_call_operand.vmem [shape: f32[1,8], index: 10, kind: input, shape index: {}]   ;;  %s1703_s11 = inlined_call_operand.vmem [shape: f32[4,16,8], index: 11, kind: output, shape index: {0}]   ;;  %s1704_s12 = inlined_call_operand.vmem [shape: f32[4,16,8], index: 12, kind: output, shape index: {1}]   ;;  %s1705_s13 = inlined_call_operand.vmem [shape: f32[24,8], index: 13, kind: output, shape index: {2}]   ;;  %s1706_s14 = inlined_call_operand.hbm [shape: f32[4,8], index: 14, kind: output, shape index: {3}]  }
   0x1   :  { %v85_v0 = vld [vmem:[%s1695_s3 + $0x18] sm:$0xff]  ;;  %v84_v1 = vld [vmem:[%s1695_s3 + $0x10] sm:$0xff]  ;;  %v43_v2 = vld [vmem:[%s1692_s0] sm:$0xff] }
   0x2   :  { %138 = vmatpush.msra.mxu0 %v85_v0  ;;  %v44_v3 = vld [vmem:[%s1692_s0 + $0x8] sm:$0xff]  ;;  %52 = vst.msk [vmem:[#allocation2] sm:$0xff] %vm51_vm0, %v43_v2  ;;  %v45_v5 = vld [vmem:[%s1692_s0 + $0x10] sm:$0xff]  ;;  %v46_v6 = vld [vmem:[%s1692_s0 + $0x18] sm:$0xff] }
   0x3   :  { %v83_v4 = vld [vmem:[%s1695_s3 + $0x8] sm:$0xff]  ;;  %53 = vst.msk [vmem:[#allocation2 + $0x8] sm:$0xff] %vm51_vm0, %v44_v3  ;;  %v47_v7 = vld [vmem:[%s1692_s0 + $0x20] sm:$0xff] }
   0x4   :  { %139 = vmatpush.msra.mxu0 %v84_v1  ;;  %v82_v8 = vld [vmem:[%s1695_s3] sm:$0xff]  ;;  %54 = vst.msk [vmem:[#allocation2 + $0x10] sm:$0xff] %vm51_vm0, %v45_v5 }
   0x5   :  { %55 = vst.msk [vmem:[#allocation2 + $0x18] sm:$0xff] %vm51_vm0, %v46_v6 }
   0x6   :  { %140 = vmatpush.msra.mxu0 %v83_v4 }
   0x7   :  { %20 = vsyncpa [#allocation4], 0  ;;  %56 = vst.msk [vmem:[#allocation2 + $0x20] sm:$0xff] %vm51_vm0, %v47_v7  ;;  %v48_v10 = vld [vmem:[%s1692_s0 + $0x28] sm:$0xff]  ;;  %v49_v12 = vld [vmem:[%s1692_s0 + $0x30] sm:$0xff]  ;;  %vm67_vm1 = vcmask 257024  }
   0x8   :  { %141 = vmatpush.msra.mxu0 %v82_v8  ;;  %57 = vst.msk [vmem:[#allocation2 + $0x28] sm:$0xff] %vm51_vm0, %v48_v10  ;;  %v50_v14 = vld [vmem:[%s1692_s0 + $0x38] sm:$0xff]  ;;  %v60_v16 = vld [vmem:[%s1693_s1] sm:$0xff]  ;;  %v61_v18 = vld [vmem:[%s1693_s1 + $0x8] sm:$0xff]  ;;  %v1065_v23 = vmov 0.0   ;;  %vm203_vm2 = vcmask 523264  }
   0x9   :  { %v70_v9 = vld [vmem:[#allocation2] sm:$0xff]  ;;  %58 = vst.msk [vmem:[#allocation2 + $0x30] sm:$0xff] %vm51_vm0, %v49_v12  ;;  %v62_v20 = vld [vmem:[%s1693_s1 + $0x10] sm:$0xff]  ;;  %v198_v25 = vld [vmem:[%s1697_s5 + $0x38] sm:$0xff]  ;;  %vm634_vm3 = vcmask 64512   ;;  %s1066_s21 = smov [#allocation3]  }
   0xa   :  { %905 = vmatmul.msk.f32.vlgmr.msra.gmra.mxu0 %vm51_vm0, %v70_v9  ;;  %v71_v11 = vld [vmem:[#allocation2 + $0x8] sm:$0xff]  ;;  %59 = vst.msk [vmem:[#allocation2 + $0x38] sm:$0xff] %vm51_vm0, %v50_v14  ;;  %v66_v22 = vld [vmem:[%s1694_s2] sm:$0xf]  ;;  %v197_v26 = vld [vmem:[%s1697_s5 + $0x30] sm:$0xff]  ;;  %248 = vmatpush.msra.mxu1 %v198_v25  ;;  %s888_s22 = sshll.u32 %s1066_s21, 4  ;;  %s889_s22 = int_to_ptr.vmem [resolvable:$true] %s888_s22 }
   0xb   :  { %v72_v13 = vld [vmem:[#allocation2 + $0x10] sm:$0xff]  ;;  %63 = vst.msk [vmem:[#allocation2 + $0x40] sm:$0xff] %vm51_vm0, %v60_v16  ;;  %v196_v27 = vld [vmem:[%s1697_s5 + $0x28] sm:$0xff]  ;;  %v195_v28 = vld [vmem:[%s1697_s5 + $0x20] sm:$0xff] }
   0xc   :  { %v73_v15 = vld [vmem:[#allocation2 + $0x18] sm:$0xff]  ;;  %64 = vst.msk [vmem:[#allocation2 + $0x48] sm:$0xff] %vm51_vm0, %v61_v18  ;;  %249 = vmatpush.msra.mxu1 %v197_v26  ;;  %v193_v34 = vld [vmem:[%s1697_s5 + $0x10] sm:$0xff]  ;;  %v192_v35 = vld [vmem:[%s1697_s5 + $0x8] sm:$0xff] }
   0xd   :  { %65 = vst.msk [vmem:[#allocation2 + $0x50] sm:$0xff] %vm51_vm0, %v62_v20  ;;  %v194_v30 = vld [vmem:[%s1697_s5 + $0x18] sm:$0xff]  ;;  %v191_v36 = vld [vmem:[%s1697_s5] sm:$0xff]  ;;  %v311_v0 = vld [vmem:[%s1699_s7 + $0x30] sm:$0xff] }
   0xe   :  { %v74_v17 = vld [vmem:[#allocation2 + $0x20] sm:$0xff]  ;;  %68 = vst.msk [vmem:[#allocation2 + $0x58] sm:$0xf] %vm67_vm1, %v66_v22  ;;  %250 = vmatpush.msra.mxu1 %v196_v27  ;;  %v312_v62 = vld [vmem:[%s1699_s7 + $0x38] sm:$0xff]  ;;  %v646_v1 = vld [vmem:[%s1701_s9 + $0x30] sm:$0xff] }
   0xf   :  { %v75_v19 = vld [vmem:[#allocation2 + $0x28] sm:$0xff]  ;;  %69 = vst.msk [vmem:[#allocation2 + $0x5c] sm:$0xf] %vm67_vm1, %v1065_v23  ;;  %v1240_v37 = vld [vmem:[%s1696_s4] ss:$0 sm:$0xff]  ;;  %v647_v63 = vld [vmem:[%s1701_s9 + $0x38] sm:$0xff]  ;;  %361 = vmatpush.msra.mxu2 %v312_v62 }
  0x10   :  { %v76_v21 = vld [vmem:[#allocation2 + $0x30] sm:$0xff]  ;;  %251 = vmatpush.msra.mxu1 %v195_v28  ;;  %660 = vmatpush.msra.mxu3 %v647_v63  ;;  %v310_v2 = vld [vmem:[%s1699_s7 + $0x28] sm:$0xff]  ;;  %v309_v6 = vld [vmem:[%s1699_s7 + $0x20] sm:$0xff] }
  0x11   :  { %v77_v24 = vld [vmem:[#allocation2 + $0x38] sm:$0xff]  ;;  %v645_v3 = vld [vmem:[%s1701_s9 + $0x28] sm:$0xff]  ;;  %362 = vmatpush.msra.mxu2 %v311_v0  ;;  %v644_v7 = vld [vmem:[%s1701_s9 + $0x20] sm:$0xff] }
  0x12   :  { %906 = vmatmul.msk.f32.gmra.mxu0 %vm51_vm0, %v71_v11  ;;  %v78_v29 = vld [vmem:[#allocation2 + $0x40] sm:$0xff]  ;;  %252 = vmatpush.msra.mxu1 %v194_v30  ;;  %v308_v9 = vld [vmem:[%s1699_s7 + $0x18] sm:$0xff]  ;;  %v307_v20 = vld [vmem:[%s1699_s7 + $0x10] sm:$0xff] }
  0x13   :  { %v79_v31 = vld [vmem:[#allocation2 + $0x48] sm:$0xff]  ;;  %661 = vmatpush.msra.mxu3 %v646_v1  ;;  %363 = vmatpush.msra.mxu2 %v310_v2  ;;  %v643_v10 = vld [vmem:[%s1701_s9 + $0x18] sm:$0xff]  ;;  %v640_v25 = vld [vmem:[%s1701_s9] sm:$0xff] }
  0x14   :  { %v80_v32 = vld [vmem:[#allocation2 + $0x50] sm:$0xff]  ;;  %253 = vmatpush.msra.mxu1 %v193_v34  ;;  %v306_v22 = vld [vmem:[%s1699_s7 + $0x8] sm:$0xff]  ;;  %v964_v26 = vld [vmem:[%s1698_s6] ss:$0 sm:$0xff] }
  0x15   :  { %662 = vmatpush.msra.mxu3 %v645_v3  ;;  %364 = vmatpush.msra.mxu2 %v309_v6  ;;  %v641_v23 = vld [vmem:[%s1701_s9 + $0x8] sm:$0xff]  ;;  %v1340_v63 = vld [vmem:[%s1700_s8] ss:$0 sm:$0xff] }
  0x16   :  { %v81_v33 = vld [vmem:[#allocation2 + $0x58] sm:$0xff]  ;;  %254 = vmatpush.msra.mxu1 %v192_v35 }
  0x17   :  { %663 = vmatpush.msra.mxu3 %v644_v7  ;;  %365 = vmatpush.msra.mxu2 %v308_v9 }
  0x18   :  { %255 = vmatpush.msra.mxu1 %v191_v36 }
  0x19   :  { %664 = vmatpush.msra.mxu3 %v643_v10  ;;  %366 = vmatpush.msra.mxu2 %v307_v20 }
  0x1a   :  { %907 = vmatmul.msk.f32.gmra.mxu0 %vm51_vm0, %v72_v13 }
  0x1b   :  { %367 = vmatpush.msra.mxu2 %v306_v22 }
  0x22   :  { %908 = vmatmul.msk.f32.gmra.mxu0 %vm51_vm0, %v73_v15 }
  0x2a   :  { %909 = vmatmul.msk.f32.gmra.mxu0 %vm51_vm0, %v74_v17 }
  0x32   :  { %910 = vmatmul.msk.f32.gmra.mxu0 %vm51_vm0, %v75_v19 }
  0x3a   :  { %911 = vmatmul.msk.f32.gmra.mxu0 %vm51_vm0, %v76_v21  ;;  %v642_v21 = vld [vmem:[%s1701_s9 + $0x10] sm:$0xff] }
  0x3b   :  { %665 = vmatpush.msra.mxu3 %v642_v21 }
  0x3d   :  { %666 = vmatpush.msra.mxu3 %v641_v23 }
  0x3f   :  { %667 = vmatpush.msra.mxu3 %v640_v25 }
  0x42   :  { %912 = vmatmul.msk.f32.gmra.mxu0 %vm51_vm0, %v77_v24  ;;  %v305_v24 = vld [vmem:[%s1699_s7] sm:$0xff] }
  0x43   :  { %368 = vmatpush.msra.mxu2 %v305_v24 }
  0x4a   :  { %913 = vmatmul.msk.f32.gmra.mxu0 %vm51_vm0, %v78_v29 }
  0x52   :  { %914 = vmatmul.msk.f32.gmra.mxu0 %vm51_vm0, %v79_v31 }
  0x5a   :  { %915 = vmatmul.msk.f32.gmra.mxu0 %vm51_vm0, %v80_v32 }
  0x62   :  { %916 = vmatmul.msk.f32.gmra.mxu0 %vm51_vm0, %v81_v33 }
  0x87   :  { %v143_v38 = vpop.f32.mrf.mxu0 }
  0x88   :  { %v144_v39 = vadd.f32 %v1240_v37, %v143_v38 }
  0x8a   :  { %v179_v40 = vmax.f32 %v144_v39, 0.0 }
  0x8c   :  { %917 = vmatmul.msk.f32.vlgmr.msra.gmra.mxu1 %vm203_vm2, %v179_v40 }
  0x8f   :  { %v146_v41 = vpop.f32.mrf.mxu0 }
  0x90   :  { %v147_v42 = vadd.f32 %v1240_v37, %v146_v41 }
  0x92   :  { %v180_v43 = vmax.f32 %v147_v42, 0.0 }
  0x94   :  { %918 = vmatmul.msk.f32.gmra.mxu1 %vm203_vm2, %v180_v43 }
  0x97   :  { %v149_v44 = vpop.f32.mrf.mxu0 }
  0x98   :  { %v150_v45 = vadd.f32 %v1240_v37, %v149_v44 }
  0x9a   :  { %v181_v46 = vmax.f32 %v150_v45, 0.0 }
  0x9c   :  { %919 = vmatmul.msk.f32.gmra.mxu1 %vm203_vm2, %v181_v46 }
  0x9f   :  { %v152_v47 = vpop.f32.mrf.mxu0 }
  0xa0   :  { %v153_v48 = vadd.f32 %v1240_v37, %v152_v47 }
  0xa2   :  { %v182_v49 = vmax.f32 %v153_v48, 0.0 }
  0xa4   :  { %920 = vmatmul.msk.f32.gmra.mxu1 %vm203_vm2, %v182_v49 }
  0xa7   :  { %v155_v50 = vpop.f32.mrf.mxu0 }
  0xa8   :  { %v156_v51 = vadd.f32 %v1240_v37, %v155_v50 }
  0xaa   :  { %v183_v52 = vmax.f32 %v156_v51, 0.0 }
  0xac   :  { %921 = vmatmul.msk.f32.gmra.mxu1 %vm203_vm2, %v183_v52 }
  0xaf   :  { %v158_v53 = vpop.f32.mrf.mxu0 }
  0xb0   :  { %v159_v54 = vadd.f32 %v1240_v37, %v158_v53 }
  0xb2   :  { %v184_v55 = vmax.f32 %v159_v54, 0.0 }
  0xb4   :  { %922 = vmatmul.msk.f32.gmra.mxu1 %vm203_vm2, %v184_v55 }
  0xb7   :  { %v161_v56 = vpop.f32.mrf.mxu0 }
  0xb8   :  { %v162_v57 = vadd.f32 %v1240_v37, %v161_v56 }
  0xba   :  { %v185_v58 = vmax.f32 %v162_v57, 0.0 }
  0xbc   :  { %923 = vmatmul.msk.f32.gmra.mxu1 %vm203_vm2, %v185_v58 }
  0xbf   :  { %v164_v59 = vpop.f32.mrf.mxu0 }
  0xc0   :  { %v165_v60 = vadd.f32 %v1240_v37, %v164_v59 }
  0xc2   :  { %v186_v61 = vmax.f32 %v165_v60, 0.0 }
  0xc4   :  { %924 = vmatmul.msk.f32.gmra.mxu1 %vm203_vm2, %v186_v61 }
  0xc7   :  { %v167_v4 = vpop.f32.mrf.mxu0 }
  0xc8   :  { %v168_v5 = vadd.f32 %v1240_v37, %v167_v4  ;;  %v1346_v4 = vld [vmem:[%s1702_s10] ss:$0 sm:$0xff] }
  0xca   :  { %v187_v8 = vmax.f32 %v168_v5, 0.0 }
  0xcc   :  { %925 = vmatmul.msk.f32.gmra.mxu1 %vm203_vm2, %v187_v8 }
  0xcf   :  { %v170_v11 = vpop.f32.mrf.mxu0 }
  0xd0   :  { %v171_v12 = vadd.f32 %v1240_v37, %v170_v11 }
  0xd2   :  { %v188_v13 = vmax.f32 %v171_v12, 0.0 }
  0xd4   :  { %926 = vmatmul.msk.f32.gmra.mxu1 %vm203_vm2, %v188_v13 }
  0xd7   :  { %v173_v14 = vpop.f32.mrf.mxu0 }
  0xd8   :  { %v174_v15 = vadd.f32 %v1240_v37, %v173_v14 }
  0xda   :  { %v189_v16 = vmax.f32 %v174_v15, 0.0 }
  0xdc   :  { %927 = vmatmul.msk.f32.gmra.mxu1 %vm203_vm2, %v189_v16 }
  0xdf   :  { %v176_v17 = vpop.f32.mrf.mxu0 }
  0xe0   :  { %v177_v18 = vadd.f32 %v1240_v37, %v176_v17 }
  0xe2   :  { %v190_v19 = vmax.f32 %v177_v18, 0.0 }
  0xe4   :  { %928 = vmatmul.msk.f32.gmra.mxu1 %vm203_vm2, %v190_v19 }
 0x109   :  { %v257_v27 = vpop.f32.mrf.mxu1 }
 0x10a   :  { %v258_v28 = vadd.f32 %v964_v26, %v257_v27 }
 0x10c   :  { %v293_v29 = vmax.f32 %v258_v28, 0.0 }
 0x10e   :  { %929 = vmatmul.msk.f32.vlgmr.msra.gmra.mxu2 %vm203_vm2, %v293_v29  ;;  %953 = vmatmul.msk.f32.vlgmr.msra.gmra.mxu3 %vm203_vm2, %v293_v29 }
 0x111   :  { %v260_v30 = vpop.f32.mrf.mxu1 }
 0x112   :  { %v261_v31 = vadd.f32 %v964_v26, %v260_v30 }
 0x114   :  { %v294_v32 = vmax.f32 %v261_v31, 0.0 }
 0x116   :  { %930 = vmatmul.msk.f32.gmra.mxu2 %vm203_vm2, %v294_v32  ;;  %954 = vmatmul.msk.f32.gmra.mxu3 %vm203_vm2, %v294_v32 }
 0x119   :  { %v263_v33 = vpop.f32.mrf.mxu1 }
 0x11a   :  { %v264_v34 = vadd.f32 %v964_v26, %v263_v33 }
 0x11c   :  { %v295_v35 = vmax.f32 %v264_v34, 0.0 }
 0x11e   :  { %931 = vmatmul.msk.f32.gmra.mxu2 %vm203_vm2, %v295_v35  ;;  %955 = vmatmul.msk.f32.gmra.mxu3 %vm203_vm2, %v295_v35 }
 0x121   :  { %v266_v36 = vpop.f32.mrf.mxu1 }
 0x122   :  { %v267_v37 = vadd.f32 %v964_v26, %v266_v36 }
 0x124   :  { %v296_v38 = vmax.f32 %v267_v37, 0.0 }
 0x126   :  { %932 = vmatmul.msk.f32.gmra.mxu2 %vm203_vm2, %v296_v38  ;;  %956 = vmatmul.msk.f32.gmra.mxu3 %vm203_vm2, %v296_v38 }
 0x129   :  { %v269_v39 = vpop.f32.mrf.mxu1 }
 0x12a   :  { %v270_v40 = vadd.f32 %v964_v26, %v269_v39 }
 0x12c   :  { %v297_v41 = vmax.f32 %v270_v40, 0.0 }
 0x12e   :  { %933 = vmatmul.msk.f32.gmra.mxu2 %vm203_vm2, %v297_v41  ;;  %957 = vmatmul.msk.f32.gmra.mxu3 %vm203_vm2, %v297_v41 }
 0x131   :  { %v272_v42 = vpop.f32.mrf.mxu1 }
 0x132   :  { %v273_v43 = vadd.f32 %v964_v26, %v272_v42 }
 0x134   :  { %v298_v44 = vmax.f32 %v273_v43, 0.0 }
 0x136   :  { %934 = vmatmul.msk.f32.gmra.mxu2 %vm203_vm2, %v298_v44  ;;  %958 = vmatmul.msk.f32.gmra.mxu3 %vm203_vm2, %v298_v44 }
 0x139   :  { %v275_v45 = vpop.f32.mrf.mxu1 }
 0x13a   :  { %v276_v46 = vadd.f32 %v964_v26, %v275_v45 }
 0x13c   :  { %v299_v47 = vmax.f32 %v276_v46, 0.0 }
 0x13e   :  { %935 = vmatmul.msk.f32.gmra.mxu2 %vm203_vm2, %v299_v47  ;;  %959 = vmatmul.msk.f32.gmra.mxu3 %vm203_vm2, %v299_v47 }
 0x141   :  { %v278_v48 = vpop.f32.mrf.mxu1 }
 0x142   :  { %v279_v49 = vadd.f32 %v964_v26, %v278_v48 }
 0x144   :  { %v300_v50 = vmax.f32 %v279_v49, 0.0 }
 0x146   :  { %936 = vmatmul.msk.f32.gmra.mxu2 %vm203_vm2, %v300_v50  ;;  %960 = vmatmul.msk.f32.gmra.mxu3 %vm203_vm2, %v300_v50 }
 0x149   :  { %v281_v51 = vpop.f32.mrf.mxu1 }
 0x14a   :  { %v282_v52 = vadd.f32 %v964_v26, %v281_v51 }
 0x14c   :  { %v301_v53 = vmax.f32 %v282_v52, 0.0 }
 0x14e   :  { %937 = vmatmul.msk.f32.gmra.mxu2 %vm203_vm2, %v301_v53 }
 0x151   :  { %v284_v54 = vpop.f32.mrf.mxu1 }
 0x152   :  { %v285_v55 = vadd.f32 %v964_v26, %v284_v54 }
 0x154   :  { %v302_v56 = vmax.f32 %v285_v55, 0.0 }
 0x156   :  { %938 = vmatmul.msk.f32.gmra.mxu2 %vm203_vm2, %v302_v56 }
 0x159   :  { %v287_v57 = vpop.f32.mrf.mxu1 }
 0x15a   :  { %v288_v58 = vadd.f32 %v964_v26, %v287_v57 }
 0x15c   :  { %v303_v59 = vmax.f32 %v288_v58, 0.0 }
 0x15e   :  { %939 = vmatmul.msk.f32.gmra.mxu2 %vm203_vm2, %v303_v59 }
 0x161   :  { %v290_v60 = vpop.f32.mrf.mxu1 }
 0x162   :  { %v291_v61 = vadd.f32 %v964_v26, %v290_v60 }
 0x164   :  { %v304_v62 = vmax.f32 %v291_v61, 0.0 }
 0x166   :  { %940 = vmatmul.msk.f32.gmra.mxu2 %vm203_vm2, %v304_v62 }
 0x191   :  { %v370_v0 = vpop.f32.mrf.mxu2  ;;  %v669_v1 = vpop.f32.mrf.mxu3 }
 0x192   :  { %v371_v2 = vadd.f32 %v1340_v63, %v370_v0  ;;  %v670_v5 = vadd.f32 %v1346_v4, %v669_v1 }
 0x194   :  { %v941_v3 = vmul.f32 -1.442695, %v371_v2  ;;  %v693_v11 = vsel %vm634_vm3, %v670_v5, -inf }
 0x196   :  { %967 = vpow2.f32 %v941_v3 }
 0x199   :  { %v373_v6 = vpop.f32.mrf.mxu2  ;;  %v672_v7 = vpop.f32.mrf.mxu3 }
 0x19a   :  { %v374_v8 = vadd.f32 %v1340_v63, %v373_v6  ;;  %v673_v9 = vadd.f32 %v1346_v4, %v672_v7 }
 0x19c   :  { %v968_v10 = vpop.eup %967  ;;  %v942_v12 = vmul.f32 -1.442695, %v374_v8  ;;  %v694_v13 = vsel %vm634_vm3, %v673_v9, -inf }
 0x19d   :  { %v442_v14 = vadd.f32 1.0, %v968_v10  ;;  %v695_v15 = vmax.f32 %v693_v11, %v694_v13 }
 0x19e   :  { %969 = vpow2.f32 %v942_v12 }
 0x19f   :  { %971 = vrcp.f32 %v442_v14  ;;  %v696_v16 = vrot.slane %v695_v15, 4  ;;  %v463_v30 = vand.u32 2147483647, %v442_v14  ;;  %v465_v31 = vand.u32 2147483648, %v442_v14 }
 0x1a0   :  { %vm459_vm5 = vweird.f32 %v442_v14 }
 0x1a1   :  { %v376_v17 = vpop.f32.mrf.mxu2  ;;  %v675_v18 = vpop.f32.mrf.mxu3  ;;  %v697_v19 = vmax.f32 %v695_v15, %v696_v16  ;;  %vm464_vm7 = vcmp.eq.f32.partialorder %v463_v30, 8.507059e+37  ;;  %v466_v44 = vor.u32 1.1754944e-38, %v465_v31 }
 0x1a2   :  { %v377_v20 = vadd.f32 %v1340_v63, %v376_v17  ;;  %v1359_v42 = vadd.f32 %v1346_v4, %v675_v18 }
 0x1a3   :  { %v698_v22 = vrot.slane %v697_v19, 2 }
 0x1a4   :  { %v970_v21 = vpop.eup %969  ;;  %v943_v23 = vmul.f32 -1.442695, %v377_v20  ;;  %v702_v54 = vsel %vm634_vm3, %v1359_v42, -inf }
 0x1a5   :  { %v972_v24 = vpop.eup %971  ;;  %v443_v25 = vadd.f32 1.0, %v970_v21  ;;  %v699_v27 = vmax.f32 %v697_v19, %v698_v22 }
 0x1a6   :  { %v455_v26 = vmul.f32 %v972_v24, %v442_v14  ;;  %973 = vpow2.f32 %v943_v23  ;;  %vm460_vm4 = vweird.f32 %v972_v24 }
 0x1a7   :  { %975 = vrcp.f32 %v443_v25  ;;  %v700_v29 = vrot.slane %v699_v27, 1  ;;  %vm461_vm6 = vmor %vm459_vm5, %vm460_vm4  ;;  %v480_v55 = vand.u32 2147483648, %v443_v25  ;;  %v478_v60 = vand.u32 2147483647, %v443_v25 }
 0x1a8   :  { %v456_v28 = vsub.f32 1.0, %v455_v26  ;;  %vm474_vm9 = vweird.f32 %v443_v25 }
 0x1a9   :  { %v379_v32 = vpop.f32.mrf.mxu2  ;;  %v678_v33 = vpop.f32.mrf.mxu3  ;;  %v701_v35 = vmax.f32 %v699_v27, %v700_v29  ;;  %v481_v2 = vor.u32 1.1754944e-38, %v480_v55  ;;  %vm479_vm11 = vcmp.eq.f32.partialorder %v478_v60, 8.507059e+37 }
 0x1aa   :  { %v457_v34 = vmul.f32 %v972_v24, %v456_v28  ;;  %v380_v36 = vadd.f32 %v1340_v63, %v379_v32  ;;  %v1356_v37 = vadd.f32 %v1346_v4, %v678_v33 }
 0x1ab   :  { %v729_v40 = vsub.f32 %v670_v5, %v701_v35  ;;  %v730_v41 = vsub.f32 %v673_v9, %v701_v35 }
 0x1ac   :  { %v974_v38 = vpop.eup %973  ;;  %v458_v39 = vadd.f32 %v972_v24, %v457_v34  ;;  %v944_v46 = vmul.f32 -1.442695, %v380_v36  ;;  %v703_v50 = vsel %vm634_vm3, %v1356_v37, -inf }
 0x1ad   :  { %v976_v43 = vpop.eup %975  ;;  %v1362_v45 = vadd.f32 1.0, %v974_v38  ;;  %v737_v49 = vmul.f32 1.442695, %v729_v40  ;;  %v739_v52 = vmul.f32 1.442695, %v730_v41  ;;  %v704_v56 = vmax.f32 %v702_v54, %v703_v50 }
 0x1ae   :  { %v470_v47 = vmul.f32 %v976_v43, %v443_v25  ;;  %v462_v48 = vsel %vm461_vm6, %v972_v24, %v458_v39  ;;  %vm475_vm8 = vweird.f32 %v976_v43 }
 0x1af   :  { %v1366_v51 = vsel %vm464_vm7, %v466_v44, %v462_v48  ;;  %977 = vrcp.f32 %v1362_v45  ;;  %v705_v61 = vrot.slane %v704_v56, 4  ;;  %vm476_vm10 = vmor %vm474_vm9, %vm475_vm8  ;;  %v493_v16 = vand.u32 2147483647, %v1362_v45 }
 0x1b0   :  { %v471_v53 = vsub.f32 1.0, %v470_v47  ;;  %979 = vpow2.f32 %v737_v49  ;;  %853 = vst.msk [vmem:[%s1703_s11] sm:$0xff] %vm634_vm3, %v1366_v51  ;;  %v495_v17 = vand.u32 2147483648, %v1362_v45  ;;  %vm489_vm13 = vweird.f32 %v1362_v45 }
 0x1b1   :  { %981 = vpow2.f32 %v739_v52  ;;  %v382_v57 = vpop.f32.mrf.mxu2  ;;  %v681_v58 = vpop.f32.mrf.mxu3  ;;  %v706_v3 = vmax.f32 %v704_v56, %v705_v61  ;;  %vm494_vm15 = vcmp.eq.f32.partialorder %v493_v16, 8.507059e+37 }
 0x1b2   :  { %v472_v59 = vmul.f32 %v976_v43, %v471_v53  ;;  %983 = vpow2.f32 %v944_v46  ;;  %v383_v62 = vadd.f32 %v1340_v63, %v382_v57  ;;  %v1398_v21 = vadd.f32 %v1346_v4, %v681_v58 }
 0x1b3   :  { %v707_v12 = vrot.slane %v706_v3, 2  ;;  %v496_v33 = vor.u32 1.1754944e-38, %v495_v17 }
 0x1b4   :  { %v473_v0 = vadd.f32 %v976_v43, %v472_v59  ;;  %v945_v5 = vmul.f32 -1.442695, %v383_v62  ;;  %v711_v39 = vsel %vm634_vm3, %v1398_v21, -inf }
 0x1b5   :  { %v978_v1 = vpop.eup %977  ;;  %v708_v20 = vmax.f32 %v706_v3, %v707_v12 }
 0x1b6   :  { %v1377_v6 = vpop.eup %979  ;;  %v477_v7 = vsel %vm476_vm10, %v976_v43, %v473_v0  ;;  %v485_v8 = vmul.f32 %v978_v1, %v1362_v45  ;;  %985 = vpow2.f32 %v945_v5  ;;  %vm490_vm12 = vweird.f32 %v978_v1 }
 0x1b7   :  { %v1380_v9 = vpop.eup %981  ;;  %v1382_v10 = vsel %vm479_vm11, %v481_v2, %v477_v7  ;;  %v753_v11 = vsel %vm634_vm3, %v1377_v6, 0.0  ;;  %v709_v29 = vrot.slane %v708_v20, 1  ;;  %vm491_vm14 = vmor %vm489_vm13, %vm490_vm12 }
 0x1b8   :  { %v984_v13 = vpop.eup %983  ;;  %v754_v14 = vsel %vm634_vm3, %v1380_v9, 0.0  ;;  %854 = vst.msk [vmem:[%s1703_s11 + $0x8] sm:$0xff] %vm634_vm3, %v1382_v10  ;;  %v486_v15 = vsub.f32 1.0, %v485_v8 }
 0x1b9   :  { %v755_v18 = vadd.f32 %v754_v14, %v753_v11  ;;  %v1395_v19 = vadd.f32 1.0, %v984_v13  ;;  %v385_v22 = vpop.f32.mrf.mxu2  ;;  %v684_v23 = vpop.f32.mrf.mxu3  ;;  %v710_v36 = vmax.f32 %v708_v20, %v709_v29 }
 0x1ba   :  { %v487_v24 = vmul.f32 %v978_v1, %v486_v15  ;;  %v386_v25 = vadd.f32 %v1340_v63, %v385_v22  ;;  %v1402_v26 = vadd.f32 %v1346_v4, %v684_v23 }
 0x1bb   :  { %v756_v27 = vrot.slane %v755_v18, 4  ;;  %987 = vrcp.f32 %v1395_v19  ;;  %v731_v44 = vsub.f32 %v1359_v42, %v710_v36  ;;  %v732_v45 = vsub.f32 %v1356_v37, %v710_v36 }
 0x1bc   :  { %v488_v28 = vadd.f32 %v978_v1, %v487_v24  ;;  %v946_v30 = vmul.f32 -1.442695, %v386_v25  ;;  %v986_v31 = vpop.eup %985  ;;  %v712_v34 = vsel %vm634_vm3, %v1402_v26, -inf  ;;  %v508_v37 = vand.u32 2147483647, %v1395_v19 }
 0x1bd   :  { %v757_v32 = vadd.f32 %v756_v27, %v755_v18  ;;  %v1408_v38 = vadd.f32 1.0, %v986_v31  ;;  %v713_v43 = vmax.f32 %v711_v39, %v712_v34  ;;  %v741_v53 = vmul.f32 1.442695, %v731_v44 }
 0x1be   :  { %v492_v35 = vsel %vm491_vm14, %v978_v1, %v488_v28  ;;  %989 = vpow2.f32 %v946_v30  ;;  %v743_v54 = vmul.f32 1.442695, %v732_v45  ;;  %v510_v55 = vand.u32 2147483648, %v1395_v19 }
 0x1bf   :  { %v758_v40 = vrot.slane %v757_v32, 2  ;;  %v1412_v41 = vsel %vm494_vm15, %v496_v33, %v492_v35  ;;  %991 = vrcp.f32 %v1408_v38  ;;  %v714_v48 = vrot.slane %v713_v43, 4 }
 0x1c0   :  { %855 = vst.msk [vmem:[%s1703_s11 + $0x10] sm:$0xff] %vm634_vm3, %v1412_v41  ;;  %993 = vpow2.f32 %v741_v53  ;;  %v523_v58 = vand.u32 2147483647, %v1408_v38  ;;  %v525_v62 = vand.u32 2147483648, %v1408_v38  ;;  %vm504_vm1 = vweird.f32 %v1395_v19 }
 0x1c1   :  { %v988_v46 = vpop.eup %987  ;;  %v759_v47 = vadd.f32 %v758_v40, %v757_v32  ;;  %v388_v49 = vpop.f32.mrf.mxu2  ;;  %v715_v56 = vmax.f32 %v713_v43, %v714_v48  ;;  %995 = vpow2.f32 %v743_v54  ;;  %vm1437_vm2 = vcmp.eq.f32.partialorder %v508_v37, 8.507059e+37 }
 0x1c2   :  { %v687_v50 = vpop.f32.mrf.mxu3  ;;  %v500_v52 = vmul.f32 %v988_v46, %v1395_v19  ;;  %v389_v59 = vadd.f32 %v1340_v63, %v388_v49  ;;  %vm505_vm0 = vweird.f32 %v988_v46  ;;  %v511_v11 = vor.u32 1.1754944e-38, %v510_v55 }
 0x1c3   :  { %v760_v42 = vrot.slane %v759_v47, 1  ;;  %v1431_v0 = vadd.f32 %v1346_v4, %v687_v50  ;;  %v716_v5 = vrot.slane %v715_v56, 2  ;;  %vm506_vm4 = vmor %vm504_vm1, %vm505_vm0  ;;  %vm519_vm5 = vweird.f32 %v1408_v38 }
 0x1c4   :  { %v501_v57 = vsub.f32 1.0, %v500_v52  ;;  %v990_v60 = vpop.eup %989  ;;  %v947_v8 = vmul.f32 -1.442695, %v389_v59  ;;  %vm1444_vm6 = vcmp.eq.f32.partialorder %v523_v58, 8.507059e+37  ;;  %v526_v15 = vor.u32 1.1754944e-38, %v525_v62 }
 0x1c5   :  { %v1427_v61 = vadd.f32 %v760_v42, %v759_v47  ;;  %v992_v1 = vpop.eup %991  ;;  %v1433_v3 = vadd.f32 1.0, %v990_v60  ;;  %v1450_v16 = vsel %vm634_vm3, %v1431_v0, -inf  ;;  %v717_v23 = vmax.f32 %v715_v56, %v716_v5 }
 0x1c6   :  { %v502_v2 = vmul.f32 %v988_v46, %v501_v57  ;;  %v515_v13 = vmul.f32 %v992_v1, %v1408_v38  ;;  %v1452_v18 = vpop.eup %993  ;;  %vm520_vm8 = vweird.f32 %v992_v1 }
 0x1c7   :  { %997 = vrcp.f32 %v1427_v61  ;;  %v798_v19 = vand.u32 2147483647, %v1427_v61  ;;  %v1455_v24 = vpop.eup %995  ;;  %v800_v25 = vand.u32 2147483648, %v1427_v61  ;;  %v762_v28 = vsel %vm634_vm3, %v1452_v18, 0.0  ;;  %vm521_vm11 = vmor %vm519_vm5, %vm520_vm8 }
 0x1c8   :  { %v503_v12 = vadd.f32 %v988_v46, %v502_v2  ;;  %999 = vrcp.f32 %v1433_v3  ;;  %v516_v22 = vsub.f32 1.0, %v515_v13  ;;  %vm794_vm7 = vweird.f32 %v1427_v61 }
 0x1c9   :  { %v391_v17 = vpop.f32.mrf.mxu2  ;;  %1001 = vpow2.f32 %v947_v8  ;;  %v763_v30 = vsel %vm634_vm3, %v1455_v24, 0.0  ;;  %v718_v32 = vrot.slane %v717_v23, 1  ;;  %v538_v35 = vand.u32 2147483647, %v1433_v3 }
 0x1ca   :  { %v507_v20 = vsel %vm506_vm4, %v988_v46, %v503_v12  ;;  %v690_v29 = vpop.f32.mrf.mxu3  ;;  %v517_v31 = vmul.f32 %v992_v1, %v516_v22  ;;  %v764_v34 = vadd.f32 %v763_v30, %v762_v28  ;;  %v540_v36 = vand.u32 2147483648, %v1433_v3 }
 0x1cb   :  { %v1460_v27 = vsel %vm1437_vm2, %v511_v11, %v507_v20  ;;  %v392_v39 = vadd.f32 %v1340_v63, %v391_v17  ;;  %vm1476_vm9 = vcmp.eq.f32.partialorder %v798_v19, 8.507059e+37  ;;  %v719_v46 = vmax.f32 %v717_v23, %v718_v32 }
 0x1cc   :  { %856 = vst.msk [vmem:[%s1703_s11 + $0x18] sm:$0xff] %vm634_vm3, %v1460_v27  ;;  %v518_v45 = vadd.f32 %v992_v1, %v517_v31  ;;  %v1481_v47 = vadd.f32 %v1346_v4, %v690_v29  ;;  %v765_v48 = vrot.slane %v764_v34, 4  ;;  %v801_v2 = vor.u32 1.1754944e-38, %v800_v25 }
 0x1cd   :  { %v998_v33 = vpop.eup %997  ;;  %v948_v50 = vmul.f32 -1.442695, %v392_v39  ;;  %v733_v54 = vsub.f32 %v1398_v21, %v719_v46  ;;  %v734_v42 = vsub.f32 %v1402_v26, %v719_v46  ;;  %vm534_vm13 = vweird.f32 %v1433_v3 }
 0x1ce   :  { %v1000_v40 = vpop.eup %999  ;;  %v790_v43 = vmul.f32 %v998_v33, %v1427_v61  ;;  %vm795_vm10 = vweird.f32 %v998_v33  ;;  %v522_v53 = vsel %vm521_vm11, %v992_v1, %v518_v45  ;;  %v766_v55 = vadd.f32 %v765_v48, %v764_v34 }
 0x1cf   :  { %v530_v49 = vmul.f32 %v1000_v40, %v1433_v3  ;;  %v1002_v37 = vpop.eup %1001  ;;  %v1491_v4 = vsel %vm1444_vm6, %v526_v15, %v522_v53  ;;  %1003 = vpow2.f32 %v948_v50  ;;  %v745_v58 = vmul.f32 1.442695, %v733_v54  ;;  %vm796_vm14 = vmor %vm794_vm7, %vm795_vm10 }
 0x1d0   :  { %v791_v52 = vsub.f32 1.0, %v790_v43  ;;  %v747_v59 = vmul.f32 1.442695, %v734_v42  ;;  %857 = vst.msk [vmem:[%s1703_s11 + $0x20] sm:$0xff] %vm634_vm3, %v1491_v4  ;;  %v1498_v21 = vadd.f32 1.0, %v1002_v37  ;;  %v767_v26 = vrot.slane %v766_v55, 2 }
 0x1d1   :  { %v531_v56 = vsub.f32 1.0, %v530_v49  ;;  %v394_v57 = vpop.f32.mrf.mxu2  ;;  %vm535_vm12 = vweird.f32 %v1000_v40  ;;  %v721_v62 = vsel %vm634_vm3, %v1481_v47, -inf  ;;  %1005 = vpow2.f32 %v745_v58 }
 0x1d2   :  { %v792_v38 = vmul.f32 %v998_v33, %v791_v52  ;;  %v768_v5 = vadd.f32 %v767_v26, %v766_v55  ;;  %vm539_vm15 = vcmp.eq.f32.partialorder %v538_v35, 8.507059e+37  ;;  %1007 = vpow2.f32 %v747_v59  ;;  %vm536_vm0 = vmor %vm534_vm13, %vm535_vm12 }
 0x1d3   :  { %v532_v60 = vmul.f32 %v1000_v40, %v531_v56  ;;  %v541_v11 = vor.u32 1.1754944e-38, %v540_v36  ;;  %1009 = vrcp.f32 %v1498_v21  ;;  %v722_v12 = vmax.f32 %v1450_v16, %v721_v62 }
 0x1d4   :  { %v793_v1 = vadd.f32 %v998_v33, %v792_v38  ;;  %v769_v14 = vrot.slane %v768_v5, 1  ;;  %v395_v61 = vadd.f32 %v1340_v63, %v394_v57  ;;  %v553_v16 = vand.u32 2147483647, %v1498_v21 }
 0x1d5   :  { %v533_v7 = vadd.f32 %v1000_v40, %v532_v60  ;;  %v1004_v13 = vpop.eup %1003  ;;  %v555_v25 = vand.u32 2147483648, %v1498_v21  ;;  %v723_v30 = vrot.slane %v722_v12, 4  ;;  %vm549_vm1 = vweird.f32 %v1498_v21 }
 0x1d6   :  { %v797_v8 = vsel %vm796_vm14, %v998_v33, %v793_v1  ;;  %v1515_v22 = vadd.f32 1.0, %v1004_v13  ;;  %v1517_v23 = vadd.f32 %v769_v14, %v768_v5  ;;  %v949_v32 = vmul.f32 -1.442695, %v395_v61 }
 0x1d7   :  { %v802_v3 = vsel %vm1476_vm9, %v801_v2, %v797_v8  ;;  %v537_v15 = vsel %vm536_vm0, %v1000_v40, %v533_v7  ;;  %vm1549_vm2 = vcmp.eq.f32.partialorder %v553_v16, 8.507059e+37  ;;  %v556_v40 = vor.u32 1.1754944e-38, %v555_v25 }
 0x1d8   :  { %v845_v17 = vmul.f32 %v1377_v6, %v802_v3  ;;  %v846_v19 = vmul.f32 %v1380_v9, %v802_v3  ;;  %v1513_v20 = vsel %vm539_vm15, %v541_v11, %v537_v15  ;;  %v1526_v6 = vpop.eup %1005  ;;  %1011 = vrcp.f32 %v1515_v22 }
 0x1d9   :  { %858 = vst.msk [vmem:[%s1703_s11 + $0x28] sm:$0xff] %vm634_vm3, %v1513_v20  ;;  %v397_v28 = vpop.f32.mrf.mxu2  ;;  %v1531_v31 = vpop.eup %1007  ;;  %1013 = vrcp.f32 %v1517_v23  ;;  %v771_v34 = vsel %vm634_vm3, %v1526_v6, 0.0  ;;  %v812_v36 = vand.u32 2147483647, %v1517_v23  ;;  %v724_v43 = vmax.f32 %v722_v12, %v723_v30 }
 0x1da   :  { %v861_v9 = vmul.f32 %v845_v17, %v1366_v51  ;;  %v862_v29 = vmul.f32 %v846_v19, %v1382_v10  ;;  %v1010_v33 = vpop.eup %1009  ;;  %v772_v51 = vsel %vm634_vm3, %v1531_v31, 0.0  ;;  %vm564_vm4 = vweird.f32 %v1515_v22 }
 0x1db   :  { %v773_v10 = vadd.f32 %v772_v51, %v771_v34  ;;  %v545_v35 = vmul.f32 %v1010_v33, %v1498_v21  ;;  %1015 = vpow2.f32 %v949_v32  ;;  %v398_v46 = vadd.f32 %v1340_v63, %v397_v28 }
 0x1dc   :  { %869 = vst.msk [vmem:[%s1704_s12] sm:$0xff] %vm634_vm3, %v861_v9  ;;  %vm808_vm5 = vweird.f32 %v1517_v23  ;;  %v814_v49 = vand.u32 2147483648, %v1517_v23  ;;  %v568_v50 = vand.u32 2147483647, %v1515_v22  ;;  %v570_v52 = vand.u32 2147483648, %v1515_v22 }
 0x1dd   :  { %870 = vst.msk [vmem:[%s1704_s12 + $0x8] sm:$0xff] %vm634_vm3, %v862_v29  ;;  %v774_v44 = vrot.slane %v773_v10, 4  ;;  %v546_v45 = vsub.f32 1.0, %v545_v35  ;;  %v725_v53 = vrot.slane %v724_v43, 2  ;;  %vm550_vm6 = vweird.f32 %v1010_v33 }
 0x1de   :  { %v1012_v48 = vpop.eup %1011  ;;  %vm1561_vm7 = vcmp.eq.f32.partialorder %v812_v36, 8.507059e+37  ;;  %v950_v59 = vmul.f32 -1.442695, %v398_v46  ;;  %vm551_vm10 = vmor %vm549_vm1, %vm550_vm6  ;;  %v571_v19 = vor.u32 1.1754944e-38, %v570_v52  ;;  %v815_v9 = vor.u32 1.1754944e-38, %v814_v49 }
 0x1df   :  { %v1014_v54 = vpop.eup %1013  ;;  %v775_v42 = vadd.f32 %v774_v44, %v773_v10  ;;  %v547_v37 = vmul.f32 %v1010_v33, %v546_v45  ;;  %v560_v55 = vmul.f32 %v1012_v48, %v1515_v22  ;;  %vm565_vm8 = vweird.f32 %v1012_v48 }
 0x1e0   :  { %v804_v57 = vmul.f32 %v1014_v54, %v1517_v23  ;;  %v726_v58 = vmax.f32 %v724_v43, %v725_v53  ;;  %vm809_vm9 = vweird.f32 %v1014_v54  ;;  %1017 = vpow2.f32 %v950_v59  ;;  %vm566_vm11 = vmor %vm564_vm4, %vm565_vm8 }
 0x1e1   :  { %v400_v56 = vpop.f32.mrf.mxu2  ;;  %v776_v26 = vrot.slane %v775_v42, 2  ;;  %v548_v60 = vadd.f32 %v1010_v33, %v547_v37  ;;  %v561_v62 = vsub.f32 1.0, %v560_v55  ;;  %v1016_v7 = vpop.eup %1015  ;;  %vm810_vm12 = vmor %vm808_vm5, %vm809_vm9  ;;  %vm569_vm13 = vcmp.eq.f32.partialorder %v568_v50, 8.507059e+37 }
 0x1e2   :  { %v401_v1 = vadd.f32 %v1340_v63, %v400_v56  ;;  %v805_v2 = vsub.f32 1.0, %v804_v57  ;;  %v727_v5 = vrot.slane %v726_v58, 1  ;;  %v1572_v61 = vadd.f32 1.0, %v1016_v7 }
 0x1e3   :  { %v777_v8 = vadd.f32 %v776_v26, %v775_v42  ;;  %v562_v11 = vmul.f32 %v1012_v48, %v561_v62  ;;  %v552_v12 = vsel %vm551_vm10, %v1010_v33, %v548_v60 }
 0x1e4   :  { %v951_v13 = vmul.f32 -1.442695, %v401_v1  ;;  %v806_v3 = vmul.f32 %v1014_v54, %v805_v2  ;;  %v1570_v14 = vsel %vm1549_vm2, %v556_v40, %v552_v12  ;;  %v728_v15 = vmax.f32 %v726_v58, %v727_v5 }
 0x1e5   :  { %v778_v17 = vrot.slane %v777_v8, 1  ;;  %v563_v16 = vadd.f32 %v1012_v48, %v562_v11  ;;  %859 = vst.msk [vmem:[%s1703_s11 + $0x30] sm:$0xff] %vm634_vm3, %v1570_v14  ;;  %vm579_vm14 = vweird.f32 %v1572_v61  ;;  %v585_v49 = vand.u32 2147483648, %v1572_v61 }
 0x1e6   :  { %1019 = vpow2.f32 %v951_v13  ;;  %v807_v21 = vadd.f32 %v1014_v54, %v806_v3  ;;  %v735_v25 = vsub.f32 %v1431_v0, %v728_v15  ;;  %v736_v28 = vsub.f32 %v1481_v47, %v728_v15  ;;  %v1018_v32 = vpop.eup %1017 }
 0x1e7   :  { %1021 = vrcp.f32 %v1572_v61  ;;  %v1588_v29 = vadd.f32 %v778_v17, %v777_v8  ;;  %v567_v30 = vsel %vm566_vm11, %v1012_v48, %v563_v16  ;;  %v1604_v40 = vadd.f32 1.0, %v1018_v32 }
 0x1e8   :  { %v811_v33 = vsel %vm810_vm12, %v1014_v54, %v807_v21  ;;  %v1590_v34 = vsel %vm569_vm13, %v571_v19, %v567_v30  ;;  %v749_v22 = vmul.f32 1.442695, %v735_v25  ;;  %v751_v51 = vmul.f32 1.442695, %v736_v28 }
 0x1e9   :  { %v816_v0 = vsel %vm1561_vm7, %v815_v9, %v811_v33  ;;  %1023 = vrcp.f32 %v1588_v29  ;;  %860 = vst.msk [vmem:[%s1703_s11 + $0x38] sm:$0xff] %vm634_vm3, %v1590_v34  ;;  %v403_v45 = vpop.f32.mrf.mxu2  ;;  %v828_v52 = vand.u32 2147483648, %v1588_v29  ;;  %vm822_vm0 = vweird.f32 %v1588_v29 }
 0x1ea   :  { %v847_v47 = vmul.f32 %v1452_v18, %v816_v0  ;;  %v848_v23 = vmul.f32 %v1455_v24, %v816_v0  ;;  %1025 = vpow2.f32 %v749_v22  ;;  %v404_v55 = vadd.f32 %v1340_v63, %v403_v45 }
 0x1eb   :  { %1027 = vpow2.f32 %v751_v51  ;;  %v586_v26 = vor.u32 1.1754944e-38, %v585_v49  ;;  %v829_v1 = vor.u32 1.1754944e-38, %v828_v52  ;;  %v598_v11 = vand.u32 2147483647, %v1604_v40 }
 0x1ec   :  { %v1020_v10 = vpop.eup %1019  ;;  %v863_v36 = vmul.f32 %v847_v47, %v1412_v41  ;;  %v864_v39 = vmul.f32 %v848_v23, %v1460_v27  ;;  %1029 = vrcp.f32 %v1604_v40  ;;  %v826_v41 = vand.u32 2147483647, %v1588_v29 }
 0x1ed   :  { %v1022_v35 = vpop.eup %1021  ;;  %v1607_v44 = vadd.f32 1.0, %v1020_v10  ;;  %v583_v27 = vand.u32 2147483647, %v1572_v61  ;;  %v952_v60 = vmul.f32 -1.442695, %v404_v55  ;;  %v600_v15 = vand.u32 2147483648, %v1604_v40 }
 0x1ee   :  { %v575_v43 = vmul.f32 %v1022_v35, %v1572_v61  ;;  %871 = vst.msk [vmem:[%s1704_s12 + $0x10] sm:$0xff] %vm634_vm3, %v863_v36  ;;  %vm580_vm15 = vweird.f32 %v1022_v35  ;;  %vm1635_vm1 = vcmp.eq.f32.partialorder %v826_v41, 8.507059e+37  ;;  %vm594_vm9 = vweird.f32 %v1604_v40 }
 0x1ef   :  { %v1024_v18 = vpop.eup %1023  ;;  %872 = vst.msk [vmem:[%s1704_s12 + $0x18] sm:$0xff] %vm634_vm3, %v864_v39  ;;  %1031 = vrcp.f32 %v1607_v44  ;;  %vm584_vm2 = vcmp.eq.f32.partialorder %v583_v27, 8.507059e+37  ;;  %vm581_vm5 = vmor %vm579_vm14, %vm580_vm15  ;;  %v613_v19 = vand.u32 2147483647, %v1607_v44  ;;  %v615_v16 = vand.u32 2147483648, %v1607_v44 }
 0x1f0   :  { %v576_v24 = vsub.f32 1.0, %v575_v43  ;;  %v1621_v46 = vpop.eup %1025  ;;  %v818_v48 = vmul.f32 %v1024_v18, %v1588_v29  ;;  %vm823_vm4 = vweird.f32 %v1024_v18  ;;  %1033 = vpow2.f32 %v952_v60 }
 0x1f1   :  { %v1626_v50 = vpop.eup %1027  ;;  %v780_v53 = vsel %vm634_vm3, %v1621_v46, 0.0  ;;  %vm824_vm6 = vmor %vm822_vm0, %vm823_vm4  ;;  %vm609_vm10 = vweird.f32 %v1607_v44  ;;  %v601_v0 = vor.u32 1.1754944e-38, %v600_v15  ;;  %vm599_vm12 = vcmp.eq.f32.partialorder %v598_v11, 8.507059e+37 }
 0x1f2   :  { %v577_v54 = vmul.f32 %v1022_v35, %v576_v24  ;;  %v819_v42 = vsub.f32 1.0, %v818_v48  ;;  %v781_v37 = vsel %vm634_vm3, %v1626_v50, 0.0  ;;  %v1030_v58 = vpop.eup %1029  ;;  %vm614_vm14 = vcmp.eq.f32.partialorder %v613_v19, 8.507059e+37 }
 0x1f3   :  { %v782_v57 = vadd.f32 %v781_v37, %v780_v53  ;;  %v590_v63 = vmul.f32 %v1030_v58, %v1604_v40  ;;  %vm595_vm7 = vweird.f32 %v1030_v58 }
 0x1f4   :  { %v578_v38 = vadd.f32 %v1022_v35, %v577_v54  ;;  %v820_v59 = vmul.f32 %v1024_v18, %v819_v42  ;;  %vm596_vm11 = vmor %vm594_vm9, %vm595_vm7 }
 0x1f5   :  { %v1032_v62 = vpop.eup %1031  ;;  %v783_v2 = vrot.slane %v782_v57, 4  ;;  %v591_v3 = vsub.f32 1.0, %v590_v63 }
 0x1f6   :  { %v582_v5 = vsel %vm581_vm5, %v1022_v35, %v578_v38  ;;  %v821_v7 = vadd.f32 %v1024_v18, %v820_v59  ;;  %v605_v12 = vmul.f32 %v1032_v62, %v1607_v44  ;;  %vm610_vm8 = vweird.f32 %v1032_v62  ;;  %v1034_v23 = vpop.eup %1033 }
 0x1f7   :  { %v587_v8 = vsel %vm584_vm2, %v586_v26, %v582_v5  ;;  %v784_v13 = vadd.f32 %v783_v2, %v782_v57  ;;  %v592_v28 = vmul.f32 %v1030_v58, %v591_v3  ;;  %vm611_vm13 = vmor %vm609_vm10, %vm610_vm8  ;;  %vm638_vm5 = vcmask 60416  }
 0x1f8   :  { %635 = vst.msk [vmem:[%s1705_s13] sm:$0xff] %vm634_vm3, %v587_v8  ;;  %v825_v61 = vsel %vm824_vm6, %v1024_v18, %v821_v7  ;;  %v606_v17 = vsub.f32 1.0, %v605_v12 }
 0x1f9   :  { %v830_v21 = vsel %vm1635_vm1, %v829_v1, %v825_v61  ;;  %v785_v25 = vrot.slane %v784_v13, 2  ;;  %v593_v33 = vadd.f32 %v1030_v58, %v592_v28 }
 0x1fa   :  { %v849_v9 = vmul.f32 %v1526_v6, %v830_v21  ;;  %v850_v29 = vmul.f32 %v1531_v31, %v830_v21  ;;  %v607_v30 = vmul.f32 %v1032_v62, %v606_v17  ;;  %v616_v31 = vor.u32 1.1754944e-38, %v615_v16 }
 0x1fb   :  { %v786_v32 = vadd.f32 %v785_v25, %v784_v13  ;;  %v597_v6 = vsel %vm596_vm11, %v1030_v58, %v593_v33 }
 0x1fc   :  { %v865_v22 = vmul.f32 %v849_v9, %v1491_v4  ;;  %v866_v51 = vmul.f32 %v850_v29, %v1513_v20  ;;  %v608_v47 = vadd.f32 %v1032_v62, %v607_v30  ;;  %v602_v35 = vsel %vm599_vm12, %v601_v0, %v597_v6 }
 0x1fd   :  { %v787_v10 = vrot.slane %v786_v32, 1  ;;  %v453_v4 = vadd.f32 1.0, %v1034_v23  ;;  %636 = vst.msk [vmem:[%s1705_s13 + $0x8] sm:$0xff] %vm634_vm3, %v602_v35 }
 0x1fe   :  { %873 = vst.msk [vmem:[%s1704_s12 + $0x20] sm:$0xff] %vm634_vm3, %v865_v22  ;;  %v612_v36 = vsel %vm611_vm13, %v1032_v62, %v608_v47 }
 0x1ff   :  { %874 = vst.msk [vmem:[%s1704_s12 + $0x28] sm:$0xff] %vm634_vm3, %v866_v51  ;;  %v788_v20 = vadd.f32 %v787_v10, %v786_v32  ;;  %v617_v39 = vsel %vm614_vm14, %v616_v31, %v612_v36  ;;  %1035 = vrcp.f32 %v453_v4  ;;  %v630_v27 = vand.u32 2147483648, %v453_v4 }
 0x200   :  { %637 = vst.msk [vmem:[%s1705_s13 + $0x10] sm:$0xff] %vm634_vm3, %v617_v39  ;;  %v628_v49 = vand.u32 2147483647, %v453_v4  ;;  %s890_s13 = sshll.u32 %s1706_s14, 4  ;;  %vm624_vm1 = vweird.f32 %v453_v4  ;;  %s891_s13 = int_to_ptr.hbm [resolvable:$true] %s890_s13 }
 0x201   :  { %1037 = vrcp.f32 %v788_v20  ;;  %v842_v45 = vand.u32 2147483648, %v788_v20  ;;  %v840_v53 = vand.u32 2147483647, %v788_v20  ;;  %vm836_vm2 = vweird.f32 %v788_v20 }
 0x202   :  { %v631_v37 = vor.u32 1.1754944e-38, %v630_v27  ;;  %vm629_vm7 = vcmp.eq.f32.partialorder %v628_v49, 8.507059e+37 }
 0x203   :  { %v843_v55 = vor.u32 1.1754944e-38, %v842_v45  ;;  %vm841_vm8 = vcmp.eq.f32.partialorder %v840_v53, 8.507059e+37 }
 0x205   :  { %v1036_v40 = vpop.eup %1035 }
 0x206   :  { %v620_v44 = vmul.f32 %v1036_v40, %v453_v4  ;;  %vm625_vm15 = vweird.f32 %v1036_v40 }
 0x207   :  { %v1038_v43 = vpop.eup %1037  ;;  %vm626_vm4 = vmor %vm624_vm1, %vm625_vm15 }
 0x208   :  { %v832_v18 = vmul.f32 %v1038_v43, %v788_v20  ;;  %v621_v41 = vsub.f32 1.0, %v620_v44  ;;  %vm837_vm0 = vweird.f32 %v1038_v43 }
 0x209   :  { %vm838_vm6 = vmor %vm836_vm2, %vm837_vm0 }
 0x20a   :  { %v833_v24 = vsub.f32 1.0, %v832_v18  ;;  %v622_v48 = vmul.f32 %v1036_v40, %v621_v41 }
 0x20c   :  { %v834_v52 = vmul.f32 %v1038_v43, %v833_v24  ;;  %v623_v54 = vadd.f32 %v1036_v40, %v622_v48 }
 0x20e   :  { %v835_v42 = vadd.f32 %v1038_v43, %v834_v52  ;;  %v627_v56 = vsel %vm626_vm4, %v1036_v40, %v623_v54 }
 0x20f   :  { %v632_v38 = vsel %vm629_vm7, %v631_v37, %v627_v56 }
 0x210   :  { %v839_v57 = vsel %vm838_vm6, %v1038_v43, %v835_v42  ;;  %639 = vst.msk [vmem:[#allocation3] sm:$0xf] %vm638_vm5, %v632_v38 }
 0x211   :  { %v844_v58 = vsel %vm841_vm8, %v843_v55, %v839_v57  ;;  %893 = dma.vmem_to_hbm [thread:$0]  %s889_s22, 64, %s891_s13, [#allocation4]  }
 0x212   :  { %v851_v59 = vmul.f32 %v1621_v46, %v844_v58  ;;  %v852_v26 = vmul.f32 %v1626_v50, %v844_v58 }
 0x214   :  { %v867_v60 = vmul.f32 %v851_v59, %v1570_v14  ;;  %v868_v62 = vmul.f32 %v852_v26, %v1590_v34 }
 0x216   :  { %875 = vst.msk [vmem:[%s1704_s12 + $0x30] sm:$0xff] %vm634_vm3, %v867_v60 }
 0x217   :  { %876 = vst.msk [vmem:[%s1704_s12 + $0x38] sm:$0xff] %vm634_vm3, %v868_v62 }
 0x218   :  { %1063 = dma.done.wait [#allocation4], 64  }
 0x219   :  { %1064 = vsyncadd [#allocation4], 4294967232 }
 0x21a   :  { %904 = vsyncpa [#allocation4], 1 }

</bundles_post_ra>
